<compile_context>
chip_gen: v7x
topology: tpu7x:2x2x1
jax: 0.10.0
libtpu: 0.0.40
codegen_flags: <defaults>
</compile_context>

<pallas_src>
import functools

import jax
import jax.numpy as jnp
from jax.experimental import pallas as pl
from jax.experimental.pallas import tpu as pltpu

LANE = 128          # output (N) feature dims padded to this -> lane-dense MXU columns
BF16_SUBLANE = 16   # bf16 packs 16 rows per sublane tile

# GELU / erf constants (Abramowitz & Stegun 7.1.26), hoisted to module scope.
_INV_SQRT2 = 0.7071067811865476
_A1, _A2, _A3, _A4, _A5 = (0.254829592, -0.284496736, 1.421413741,
                           -1.453152027, 1.061405429)
_P = 0.3275911


def _round_up(n, m):
    return ((n + m - 1) // m) * m


def _gelu_exact(x):
    """Exact (erf-based) GELU: 0.5 * (x + |x| * erf(|x|/sqrt(2))).

    erf on the non-negative half via A&S 7.1.26 (|err| < 1.5e-7 with an exact
    divide); the divide is an EUP approximate reciprocal, exp is the only other
    EUP op.  Single 0.5 multiply in the epilogue (folded).
    """
    ax = jnp.abs(x)
    z = ax * _INV_SQRT2                                  # >= 0
    t = pl.reciprocal(1.0 + _P * z, approx=True)         # EUP slot, ~free
    poly = ((((_A5 * t + _A4) * t + _A3) * t + _A2) * t + _A1) * t
    e = 1.0 - poly * jnp.exp(-z * z)                     # erf(z) for z >= 0
    return 0.5 * (x + ax * e)


def _phinet_fused_kernel(*refs, acts, k_widths, out_dim):
    """Fused MLP. refs = (x, w0, b0, w1, b1, ..., out); everything in VMEM."""
    n_layers = len(acts)
    x_ref = refs[0]
    o_ref = refs[1 + 2 * n_layers]

    h = x_ref[...]                                       # (B, D0) f32, unpadded
    for l in range(n_layers):                            # static Python unroll
        w = refs[1 + 2 * l][...]                         # (K_l, N_l^pad)  bf16
        b = refs[2 + 2 * l][...]                         # (1,   N_l^pad)  f32
        kl = k_widths[l]
        lhs = h if h.shape[1] == kl else h[:, :kl]       # drop zero lanes (static)
        y = jnp.dot(lhs.astype(jnp.bfloat16), w,         # MXU: bf16 x bf16 -> f32
                    preferred_element_type=jnp.float32)
        y = y + b                                        # f32 epilogue
        if acts[l]:
            y = _gelu_exact(y)
        h = y
    h = h if h.shape[1] == out_dim else h[:, :out_dim]   # exact output width
    o_ref[...] = h.astype(o_ref.dtype)


class PhiNetPallas:
    """JAX/Pallas equivalent of the PyTorch PhiNet module."""

    def __init__(self, hidden_dims, activate_final=False, key=None):
        if key is None:
            key = jax.random.PRNGKey(0)
        self.hidden_dims = tuple(int(d) for d in hidden_dims)
        self.activate_final = activate_final

        weights, biases, acts, k_widths, n_pads = [], [], [], [], []
        for i in range(len(self.hidden_dims) - 1):
            fan_in, fan_out = self.hidden_dims[i], self.hidden_dims[i + 1]
            # Layer 0 contracts directly against the UNPADDED input, so its K
            # equals the raw input width; later layers contract against the
            # previous layer's lane-padded activation, K = fan_in rounded to the
            # bf16 sublane multiple (no more 128-padding of K -> less DMA/VMEM).
            k_store = fan_in if i == 0 else _round_up(fan_in, BF16_SUBLANE)
            n_pad = _round_up(fan_out, LANE)
            key, wk, bk = jax.random.split(key, 3)
            # Deterministic init mimicking nn.Linear's U(-1/sqrt(fan_in), +..).
            bound = 1.0 / float(fan_in) ** 0.5
            w = jax.random.uniform(wk, (fan_in, fan_out), jnp.float32,
                                   minval=-bound, maxval=bound)
            b = jax.random.uniform(bk, (fan_out,), jnp.float32,
                                   minval=-bound, maxval=bound)
            wp = jnp.zeros((k_store, n_pad), jnp.float32)
            wp = wp.at[:fan_in, :fan_out].set(w)
            bp = jnp.zeros((1, n_pad), jnp.float32).at[0, :fan_out].set(b)
            weights.append(wp.astype(jnp.bfloat16))      # bf16 MXU operand
            biases.append(bp)                            # f32 for epilogue
            k_widths.append(k_store)
            n_pads.append(n_pad)
            # PyTorch loop: `i + 1 < len(hidden_dims) or activate_final` is
            # always True inside the loop -> GELU after EVERY Linear.
            acts.append((i + 1 < len(self.hidden_dims)) or activate_final)

        self.weights = weights
        self.biases = biases
        self.acts = tuple(acts)
        self.k_widths = tuple(k_widths)
        self.n_pads = tuple(n_pads)
        self._fwd = jax.jit(self._build_forward())

    def _build_forward(self):
        weights = tuple(self.weights)
        biases = tuple(self.biases)
        acts, k_widths, n_pads = self.acts, self.k_widths, self.n_pads
        in_dim, out_dim = self.hidden_dims[0], self.hidden_dims[-1]
        kernel = functools.partial(_phinet_fused_kernel, acts=acts,
                                   k_widths=k_widths, out_dim=out_dim)

        def forward(x):
            m, k = x.shape
            assert k == in_dim
            # x passed unpadded: full-array block (m, k) is legal even when
            # k % 128 != 0 and m % 8 != 0, removing the pad XLA op entirely.
            operands = [x.astype(jnp.float32)]
            in_specs = [pl.BlockSpec((m, k), lambda i: (0, 0))]
            for w, b in zip(weights, biases):
                in_specs.append(pl.BlockSpec(w.shape, lambda i: (0, 0)))
                in_specs.append(pl.BlockSpec(b.shape, lambda i: (0, 0)))
                operands.append(w)
                operands.append(b)

            flops = 2 * m * sum(kw * np_ for kw, np_ in zip(k_widths, n_pads))
            transcendentals = m * sum(np_ for np_, a in zip(n_pads, acts) if a)
            bytes_accessed = (4 * m * k + 4 * m * out_dim
                              + sum(2 * w.size + 4 * b.size
                                    for w, b in zip(weights, biases)))

            return pl.pallas_call(
                kernel,
                out_shape=jax.ShapeDtypeStruct((m, out_dim), jnp.float32),
                grid=(1,),
                in_specs=in_specs,
                out_specs=pl.BlockSpec((m, out_dim), lambda i: (0, 0)),
                compiler_params=pltpu.CompilerParams(
                    dimension_semantics=("arbitrary",)),
                cost_estimate=pl.CostEstimate(
                    flops=flops,
                    transcendentals=transcendentals,
                    bytes_accessed=bytes_accessed),
            )(*operands)

        return forward

    def __call__(self, x):
        return self._fwd(x)


def _reference_forward(net, x):
    """Pure-JAX reference sharing the kernel's bf16-MXU / f32-epilogue math,
    but with exact jax.scipy.special.erf GELU (so only the in-kernel
    erf/reciprocal approximation differs)."""
    h = x.astype(jnp.float32)
    for w, b, act, kl in zip(net.weights, net.biases, net.acts, net.k_widths):
        lhs = h[:, :kl]
        h = jnp.dot(lhs.astype(jnp.bfloat16), w,
                    preferred_element_type=jnp.float32) + b
        if act:
            h = 0.5 * h * (1.0 + jax.scipy.special.erf(h * _INV_SQRT2))
    return h[:, :net.hidden_dims[-1]]


if __name__ == "__main__":
    key = jax.random.PRNGKey(0)
    hidden_dims = [32, 64, 128, 16]
    batch = 8

    net = PhiNetPallas(hidden_dims, activate_final=False,
                       key=jax.random.PRNGKey(0))

    xkey, _ = jax.random.split(key)
    x = jax.random.normal(xkey, (batch, hidden_dims[0]), dtype=jnp.float32)

    out = jax.block_until_ready(net(x))
    ref = jax.block_until_ready(_reference_forward(net, x))

    assert out.shape == (batch, hidden_dims[-1]), out.shape
    max_err = float(jnp.max(jnp.abs(out - ref)))
    # bf16 MXU operands + approximate erf/reciprocal => relaxed tolerance.
    assert max_err < 1e-2, f"max abs err {max_err}"

    print("KERNEL_OK")
</pallas_src>

<mosaic_0001>
module attributes {stable_mosaic.version = 11 : i64} {
  func.func @_phinet_fused_kernel(%arg0: i32, %arg1: memref<8x32xf32, #tpu.memory_space<vmem>>, %arg2: memref<32x128xbf16, #tpu.memory_space<vmem>>, %arg3: memref<1x128xf32, #tpu.memory_space<vmem>>, %arg4: memref<64x128xbf16, #tpu.memory_space<vmem>>, %arg5: memref<1x128xf32, #tpu.memory_space<vmem>>, %arg6: memref<128x128xbf16, #tpu.memory_space<vmem>>, %arg7: memref<1x128xf32, #tpu.memory_space<vmem>>, %arg8: memref<8x16xf32, #tpu.memory_space<vmem>>) attributes {dimension_semantics = [#tpu.dimension_semantics<arbitrary>], iteration_bounds = array<i64: 1>, scalar_prefetch = 0 : i64, scratch_operands = 0 : i64, tpu.core_type = #tpu.core_type<tc>, window_params = [{pipeline_mode = #tpu.pipeline_mode<synchronous>, transform_indices = @transform_0, window_bounds = array<i64: 8, 32>}, {pipeline_mode = #tpu.pipeline_mode<synchronous>, transform_indices = @transform_1, window_bounds = array<i64: 32, 128>}, {pipeline_mode = #tpu.pipeline_mode<synchronous>, transform_indices = @transform_2, window_bounds = array<i64: 1, 128>}, {pipeline_mode = #tpu.pipeline_mode<synchronous>, transform_indices = @transform_3, window_bounds = array<i64: 64, 128>}, {pipeline_mode = #tpu.pipeline_mode<synchronous>, transform_indices = @transform_4, window_bounds = array<i64: 1, 128>}, {pipeline_mode = #tpu.pipeline_mode<synchronous>, transform_indices = @transform_5, window_bounds = array<i64: 128, 128>}, {pipeline_mode = #tpu.pipeline_mode<synchronous>, transform_indices = @transform_6, window_bounds = array<i64: 1, 128>}, {pipeline_mode = #tpu.pipeline_mode<synchronous>, transform_indices = @transform_7, window_bounds = array<i64: 8, 16>}]} {
    %c0 = arith.constant 0 : index
    %c0_0 = arith.constant 0 : index
    %0 = vector.load %arg1[%c0, %c0_0] : memref<8x32xf32, #tpu.memory_space<vmem>>, vector<8x32xf32>
    %c0_1 = arith.constant 0 : index
    %c0_2 = arith.constant 0 : index
    %1 = vector.load %arg2[%c0_1, %c0_2] : memref<32x128xbf16, #tpu.memory_space<vmem>>, vector<32x128xbf16>
    %c0_3 = arith.constant 0 : index
    %c0_4 = arith.constant 0 : index
    %2 = vector.load %arg3[%c0_3, %c0_4] : memref<1x128xf32, #tpu.memory_space<vmem>>, vector<1x128xf32>
    %3 = arith.truncf %0 : vector<8x32xf32> to vector<8x32xbf16>
    %cst = arith.constant dense<0.000000e+00> : vector<8x128xf32>
    %4 = tpu.matmul %3, %1, %cst {dimension_numbers = #tpu.dot_dimension_numbers<[1], [0], [0], [1], [0, 0, 1, 1], [], []>} : vector<8x32xbf16>, vector<32x128xbf16>, vector<8x128xf32> -> vector<8x128xf32>
    %5 = vector.broadcast %2 : vector<1x128xf32> to vector<8x128xf32>
    %6 = arith.addf %4, %5 : vector<8x128xf32>
    %7 = math.absf %6 : vector<8x128xf32>
    %cst_5 = arith.constant 0.707106769 : f32
    %8 = vector.broadcast %cst_5 : f32 to vector<8x128xf32>
    %9 = arith.mulf %7, %8 : vector<8x128xf32>
    %cst_6 = arith.constant 0.327591091 : f32
    %10 = vector.broadcast %cst_6 : f32 to vector<8x128xf32>
    %11 = arith.mulf %10, %9 : vector<8x128xf32>
    %cst_7 = arith.constant 1.000000e+00 : f32
    %12 = vector.broadcast %cst_7 : f32 to vector<8x128xf32>
    %13 = arith.addf %12, %11 : vector<8x128xf32>
    %14 = tpu.reciprocal %13 {approx = true} : vector<8x128xf32> -> vector<8x128xf32>
    %cst_8 = arith.constant 1.06140542 : f32
    %15 = vector.broadcast %cst_8 : f32 to vector<8x128xf32>
    %16 = arith.mulf %15, %14 : vector<8x128xf32>
    %cst_9 = arith.constant -1.45315206 : f32
    %17 = vector.broadcast %cst_9 : f32 to vector<8x128xf32>
    %18 = arith.addf %16, %17 : vector<8x128xf32>
    %19 = arith.mulf %18, %14 : vector<8x128xf32>
    %cst_10 = arith.constant 1.42141378 : f32
    %20 = vector.broadcast %cst_10 : f32 to vector<8x128xf32>
    %21 = arith.addf %19, %20 : vector<8x128xf32>
    %22 = arith.mulf %21, %14 : vector<8x128xf32>
    %cst_11 = arith.constant -0.284496725 : f32
    %23 = vector.broadcast %cst_11 : f32 to vector<8x128xf32>
    %24 = arith.addf %22, %23 : vector<8x128xf32>
    %25 = arith.mulf %24, %14 : vector<8x128xf32>
    %cst_12 = arith.constant 0.254829586 : f32
    %26 = vector.broadcast %cst_12 : f32 to vector<8x128xf32>
    %27 = arith.addf %25, %26 : vector<8x128xf32>
    %28 = arith.mulf %27, %14 : vector<8x128xf32>
    %cst_13 = arith.constant 0.000000e+00 : f32
    %29 = vector.broadcast %cst_13 : f32 to vector<8x128xf32>
    %30 = arith.subf %29, %9 : vector<8x128xf32>
    %31 = arith.mulf %30, %9 : vector<8x128xf32>
    %32 = math.exp %31 : vector<8x128xf32>
    %33 = arith.mulf %28, %32 : vector<8x128xf32>
    %cst_14 = arith.constant 1.000000e+00 : f32
    %34 = vector.broadcast %cst_14 : f32 to vector<8x128xf32>
    %35 = arith.subf %34, %33 : vector<8x128xf32>
    %36 = arith.mulf %7, %35 : vector<8x128xf32>
    %37 = arith.addf %6, %36 : vector<8x128xf32>
    %cst_15 = arith.constant 5.000000e-01 : f32
    %38 = vector.broadcast %cst_15 : f32 to vector<8x128xf32>
    %39 = arith.mulf %38, %37 : vector<8x128xf32>
    %c0_16 = arith.constant 0 : index
    %c0_17 = arith.constant 0 : index
    %40 = vector.load %arg4[%c0_16, %c0_17] : memref<64x128xbf16, #tpu.memory_space<vmem>>, vector<64x128xbf16>
    %c0_18 = arith.constant 0 : index
    %c0_19 = arith.constant 0 : index
    %41 = vector.load %arg5[%c0_18, %c0_19] : memref<1x128xf32, #tpu.memory_space<vmem>>, vector<1x128xf32>
    %42 = vector.extract_strided_slice %39 {offsets = [0, 0], sizes = [8, 64], strides = [1, 1]} : vector<8x128xf32> to vector<8x64xf32>
    %43 = arith.truncf %42 : vector<8x64xf32> to vector<8x64xbf16>
    %cst_20 = arith.constant dense<0.000000e+00> : vector<8x128xf32>
    %44 = tpu.matmul %43, %40, %cst_20 {dimension_numbers = #tpu.dot_dimension_numbers<[1], [0], [0], [1], [0, 0, 1, 1], [], []>} : vector<8x64xbf16>, vector<64x128xbf16>, vector<8x128xf32> -> vector<8x128xf32>
    %45 = vector.broadcast %41 : vector<1x128xf32> to vector<8x128xf32>
    %46 = arith.addf %44, %45 : vector<8x128xf32>
    %47 = math.absf %46 : vector<8x128xf32>
    %cst_21 = arith.constant 0.707106769 : f32
    %48 = vector.broadcast %cst_21 : f32 to vector<8x128xf32>
    %49 = arith.mulf %47, %48 : vector<8x128xf32>
    %cst_22 = arith.constant 0.327591091 : f32
    %50 = vector.broadcast %cst_22 : f32 to vector<8x128xf32>
    %51 = arith.mulf %50, %49 : vector<8x128xf32>
    %cst_23 = arith.constant 1.000000e+00 : f32
    %52 = vector.broadcast %cst_23 : f32 to vector<8x128xf32>
    %53 = arith.addf %52, %51 : vector<8x128xf32>
    %54 = tpu.reciprocal %53 {approx = true} : vector<8x128xf32> -> vector<8x128xf32>
    %cst_24 = arith.constant 1.06140542 : f32
    %55 = vector.broadcast %cst_24 : f32 to vector<8x128xf32>
    %56 = arith.mulf %55, %54 : vector<8x128xf32>
    %cst_25 = arith.constant -1.45315206 : f32
    %57 = vector.broadcast %cst_25 : f32 to vector<8x128xf32>
    %58 = arith.addf %56, %57 : vector<8x128xf32>
    %59 = arith.mulf %58, %54 : vector<8x128xf32>
    %cst_26 = arith.constant 1.42141378 : f32
    %60 = vector.broadcast %cst_26 : f32 to vector<8x128xf32>
    %61 = arith.addf %59, %60 : vector<8x128xf32>
    %62 = arith.mulf %61, %54 : vector<8x128xf32>
    %cst_27 = arith.constant -0.284496725 : f32
    %63 = vector.broadcast %cst_27 : f32 to vector<8x128xf32>
    %64 = arith.addf %62, %63 : vector<8x128xf32>
    %65 = arith.mulf %64, %54 : vector<8x128xf32>
    %cst_28 = arith.constant 0.254829586 : f32
    %66 = vector.broadcast %cst_28 : f32 to vector<8x128xf32>
    %67 = arith.addf %65, %66 : vector<8x128xf32>
    %68 = arith.mulf %67, %54 : vector<8x128xf32>
    %cst_29 = arith.constant 0.000000e+00 : f32
    %69 = vector.broadcast %cst_29 : f32 to vector<8x128xf32>
    %70 = arith.subf %69, %49 : vector<8x128xf32>
    %71 = arith.mulf %70, %49 : vector<8x128xf32>
    %72 = math.exp %71 : vector<8x128xf32>
    %73 = arith.mulf %68, %72 : vector<8x128xf32>
    %cst_30 = arith.constant 1.000000e+00 : f32
    %74 = vector.broadcast %cst_30 : f32 to vector<8x128xf32>
    %75 = arith.subf %74, %73 : vector<8x128xf32>
    %76 = arith.mulf %47, %75 : vector<8x128xf32>
    %77 = arith.addf %46, %76 : vector<8x128xf32>
    %cst_31 = arith.constant 5.000000e-01 : f32
    %78 = vector.broadcast %cst_31 : f32 to vector<8x128xf32>
    %79 = arith.mulf %78, %77 : vector<8x128xf32>
    %c0_32 = arith.constant 0 : index
    %c0_33 = arith.constant 0 : index
    %80 = vector.load %arg6[%c0_32, %c0_33] : memref<128x128xbf16, #tpu.memory_space<vmem>>, vector<128x128xbf16>
    %c0_34 = arith.constant 0 : index
    %c0_35 = arith.constant 0 : index
    %81 = vector.load %arg7[%c0_34, %c0_35] : memref<1x128xf32, #tpu.memory_space<vmem>>, vector<1x128xf32>
    %82 = arith.truncf %79 : vector<8x128xf32> to vector<8x128xbf16>
    %cst_36 = arith.constant dense<0.000000e+00> : vector<8x128xf32>
    %83 = tpu.matmul %82, %80, %cst_36 {dimension_numbers = #tpu.dot_dimension_numbers<[1], [0], [0], [1], [0, 0, 1, 1], [], []>} : vector<8x128xbf16>, vector<128x128xbf16>, vector<8x128xf32> -> vector<8x128xf32>
    %84 = vector.broadcast %81 : vector<1x128xf32> to vector<8x128xf32>
    %85 = arith.addf %83, %84 : vector<8x128xf32>
    %86 = math.absf %85 : vector<8x128xf32>
    %cst_37 = arith.constant 0.707106769 : f32
    %87 = vector.broadcast %cst_37 : f32 to vector<8x128xf32>
    %88 = arith.mulf %86, %87 : vector<8x128xf32>
    %cst_38 = arith.constant 0.327591091 : f32
    %89 = vector.broadcast %cst_38 : f32 to vector<8x128xf32>
    %90 = arith.mulf %89, %88 : vector<8x128xf32>
    %cst_39 = arith.constant 1.000000e+00 : f32
    %91 = vector.broadcast %cst_39 : f32 to vector<8x128xf32>
    %92 = arith.addf %91, %90 : vector<8x128xf32>
    %93 = tpu.reciprocal %92 {approx = true} : vector<8x128xf32> -> vector<8x128xf32>
    %cst_40 = arith.constant 1.06140542 : f32
    %94 = vector.broadcast %cst_40 : f32 to vector<8x128xf32>
    %95 = arith.mulf %94, %93 : vector<8x128xf32>
    %cst_41 = arith.constant -1.45315206 : f32
    %96 = vector.broadcast %cst_41 : f32 to vector<8x128xf32>
    %97 = arith.addf %95, %96 : vector<8x128xf32>
    %98 = arith.mulf %97, %93 : vector<8x128xf32>
    %cst_42 = arith.constant 1.42141378 : f32
    %99 = vector.broadcast %cst_42 : f32 to vector<8x128xf32>
    %100 = arith.addf %98, %99 : vector<8x128xf32>
    %101 = arith.mulf %100, %93 : vector<8x128xf32>
    %cst_43 = arith.constant -0.284496725 : f32
    %102 = vector.broadcast %cst_43 : f32 to vector<8x128xf32>
    %103 = arith.addf %101, %102 : vector<8x128xf32>
    %104 = arith.mulf %103, %93 : vector<8x128xf32>
    %cst_44 = arith.constant 0.254829586 : f32
    %105 = vector.broadcast %cst_44 : f32 to vector<8x128xf32>
    %106 = arith.addf %104, %105 : vector<8x128xf32>
    %107 = arith.mulf %106, %93 : vector<8x128xf32>
    %cst_45 = arith.constant 0.000000e+00 : f32
    %108 = vector.broadcast %cst_45 : f32 to vector<8x128xf32>
    %109 = arith.subf %108, %88 : vector<8x128xf32>
    %110 = arith.mulf %109, %88 : vector<8x128xf32>
    %111 = math.exp %110 : vector<8x128xf32>
    %112 = arith.mulf %107, %111 : vector<8x128xf32>
    %cst_46 = arith.constant 1.000000e+00 : f32
    %113 = vector.broadcast %cst_46 : f32 to vector<8x128xf32>
    %114 = arith.subf %113, %112 : vector<8x128xf32>
    %115 = arith.mulf %86, %114 : vector<8x128xf32>
    %116 = arith.addf %85, %115 : vector<8x128xf32>
    %cst_47 = arith.constant 5.000000e-01 : f32
    %117 = vector.broadcast %cst_47 : f32 to vector<8x128xf32>
    %118 = arith.mulf %117, %116 : vector<8x128xf32>
    %119 = vector.extract_strided_slice %118 {offsets = [0, 0], sizes = [8, 16], strides = [1, 1]} : vector<8x128xf32> to vector<8x16xf32>
    %c0_48 = arith.constant 0 : index
    %c0_49 = arith.constant 0 : index
    %120 = vector.load %arg8[%c0_48, %c0_49] : memref<8x16xf32, #tpu.memory_space<vmem>>, vector<8x16xf32>
    tpu.vector_store %arg8[%c0_48, %c0_49], %119 {strides = array<i32>} : memref<8x16xf32, #tpu.memory_space<vmem>>, vector<8x16xf32>,
    return
  }
  func.func @transform_0(%arg0: i32) -> (i32, i32) {
    %c0_i32 = arith.constant 0 : i32
    %c0_i32_0 = arith.constant 0 : i32
    %c0_i32_1 = arith.constant 0 : i32
    return %c0_i32, %c0_i32_0 : i32, i32
  }
  func.func @transform_1(%arg0: i32) -> (i32, i32) {
    %c0_i32 = arith.constant 0 : i32
    %c0_i32_0 = arith.constant 0 : i32
    %c0_i32_1 = arith.constant 0 : i32
    return %c0_i32, %c0_i32_0 : i32, i32
  }
  func.func @transform_2(%arg0: i32) -> (i32, i32) {
    %c0_i32 = arith.constant 0 : i32
    %c0_i32_0 = arith.constant 0 : i32
    %c0_i32_1 = arith.constant 0 : i32
    return %c0_i32, %c0_i32_0 : i32, i32
  }
  func.func @transform_3(%arg0: i32) -> (i32, i32) {
    %c0_i32 = arith.constant 0 : i32
    %c0_i32_0 = arith.constant 0 : i32
    %c0_i32_1 = arith.constant 0 : i32
    return %c0_i32, %c0_i32_0 : i32, i32
  }
  func.func @transform_4(%arg0: i32) -> (i32, i32) {
    %c0_i32 = arith.constant 0 : i32
    %c0_i32_0 = arith.constant 0 : i32
    %c0_i32_1 = arith.constant 0 : i32
    return %c0_i32, %c0_i32_0 : i32, i32
  }
  func.func @transform_5(%arg0: i32) -> (i32, i32) {
    %c0_i32 = arith.constant 0 : i32
    %c0_i32_0 = arith.constant 0 : i32
    %c0_i32_1 = arith.constant 0 : i32
    return %c0_i32, %c0_i32_0 : i32, i32
  }
  func.func @transform_6(%arg0: i32) -> (i32, i32) {
    %c0_i32 = arith.constant 0 : i32
    %c0_i32_0 = arith.constant 0 : i32
    %c0_i32_1 = arith.constant 0 : i32
    return %c0_i32, %c0_i32_0 : i32, i32
  }
  func.func @transform_7(%arg0: i32) -> (i32, i32) {
    %c0_i32 = arith.constant 0 : i32
    %c0_i32_0 = arith.constant 0 : i32
    %c0_i32_1 = arith.constant 0 : i32
    return %c0_i32, %c0_i32_0 : i32, i32
  }
}

</mosaic_0001>

<bundles_post_ra>
// kernel: forward.1
= control target key start
LH: loop header
LB: loop body
LE: loop exit
PB: predicated region body
PF: predicated region fallthrough
CT: control target
= control target key end

     0   :  { %12 = vsyncpa [#allocation3], 0  ;;  %s757_s0 = inlined_call_operand.vmem [shape: f32[8,32], index: 0, kind: input, shape index: {}]   ;;  %s758_s1 = inlined_call_operand.vmem [shape: bf16[32,128], index: 1, kind: input, shape index: {}]   ;;  %s759_s2 = inlined_call_operand.hbm [shape: f32[1,128], index: 2, kind: input, shape index: {}]   ;;  %s760_s3 = inlined_call_operand.hbm [shape: bf16[64,128], index: 3, kind: input, shape index: {}]   ;;  %s761_s4 = inlined_call_operand.vmem [shape: f32[1,128], index: 4, kind: input, shape index: {}]   ;;  %s762_s5 = inlined_call_operand.hbm [shape: bf16[128,128], index: 5, kind: input, shape index: {}]   ;;  %s763_s6 = inlined_call_operand.vmem [shape: f32[1,128], index: 6, kind: input, shape index: {}]   ;;  %s764_s7 = inlined_call_operand.hbm [shape: f32[8,16], index: 7, kind: output, shape index: {}]  }
   0x1   :  { %13 = vsyncpa [#allocation6], 0 }
   0x2   :  { %14 = vsyncpa [#allocation4], 0  ;;  %s623_s24 = smov [#allocation5]   ;;  %s529_s28 = scalar_lea.hbm %s760_s3, 512 }
   0x3   :  { %s34_s25 = sshll.u32 %s623_s24, 4  ;;  %p530_p0 = scmp.ne.s32.totalorder %s760_s3, %s529_s28  ;;  %s35_s25 = int_to_ptr.vmem [resolvable:$true] %s34_s25 }
   0x4   :  { %p533_p1 = scmp.lt.u32.totalorder %s529_s28, %s760_s3 }
   0x6   :  { %p535_p2 = pnand %p533_p1, %p530_p0 }
   0x8   :  { %538 = shalt.err (!%p535_p2)
}
   0x9   :  { %s539_s10 = scalar_lea.vmem %s35_s25, 512  ;;  %p544_p4 = scmp.lt.s32.totalorder %s35_s25, %s35_s25 }
   0xa   :  { %p540_p3 = scmp.ne.s32.totalorder %s35_s25, %s539_s10  ;;  %p545_p5 = scmp.lt.s32.totalorder %s539_s10, %s539_s10 }
   0xc   :  { %p546_p6 = por %p545_p5, %p544_p4 }
   0xe   :  { %p547_p7 = pnand %p546_p6, %p540_p3 }
  0x10   :  { %550 = shalt.err (!%p547_p7)
}
  0x11   :  { %s624_s11 = smov 64   ;;  %s625_s12 = smov 4  }
  0x12   :  { %40 = dma.hbm_to_vmem [thread:$0]  %s760_s3, 512, %s35_s25, [#allocation6], %s624_s11, %s624_s11, %s625_s12  }
  0x13   :  { %s626_s15 = smov [#allocation2]   ;;  %s627_s17 = smov [#allocation7]  }
  0x14   :  { %s25_s16 = sshll.u32 %s626_s15, 4  ;;  %s48_s18 = sshll.u32 %s627_s17, 4  ;;  %s26_s16 = int_to_ptr.vmem [resolvable:$true] %s25_s16  ;;  %s49_s18 = int_to_ptr.vmem [resolvable:$true] %s48_s18 }
  0x15   :  { %s551_s21 = scalar_lea.hbm %s759_s2, 16 }
  0x16   :  { %p552_p8 = scmp.ne.s32.totalorder %s759_s2, %s551_s21  ;;  %p555_p9 = scmp.lt.u32.totalorder %s551_s21, %s759_s2 }
  0x18   :  { %p557_p10 = pnand %p555_p9, %p552_p8 }
  0x1a   :  { %560 = shalt.err (!%p557_p10)
}
  0x1b   :  { %s561_s3 = scalar_lea.vmem %s26_s16, 16  ;;  %s565_s25 = scalar_lea.vmem %s26_s16, 32 }
  0x1c   :  { %p562_p11 = scmp.ne.s32.totalorder %s26_s16, %s561_s3  ;;  %p566_p12 = scmp.lt.s32.totalorder %s26_s16, %s26_s16 }
  0x1d   :  { %p567_p13 = scmp.lt.s32.totalorder %s565_s25, %s561_s3 }
  0x1f   :  { %p568_p0 = por %p567_p13, %p566_p12 }
  0x21   :  { %p569_p1 = pnand %p568_p0, %p562_p11 }
  0x23   :  { %572 = shalt.err (!%p569_p1)
}
  0x24   :  { %28 = dma.hbm_to_vmem [thread:$0]  %s759_s2, 16, %s26_s16, [#allocation3]  }
  0x25   :  { %s573_s8 = scalar_lea.hbm %s762_s5, 1024 }
  0x26   :  { %p574_p2 = scmp.ne.s32.totalorder %s762_s5, %s573_s8  ;;  %p577_p3 = scmp.lt.u32.totalorder %s573_s8, %s762_s5 }
  0x28   :  { %p579_p4 = pnand %p577_p3, %p574_p2 }
  0x2a   :  { %582 = shalt.err (!%p579_p4)
}
  0x2b   :  { %s583_s15 = scalar_lea.vmem %s49_s18, 1024  ;;  %p588_p6 = scmp.lt.s32.totalorder %s49_s18, %s49_s18 }
  0x2c   :  { %p584_p5 = scmp.ne.s32.totalorder %s49_s18, %s583_s15  ;;  %p589_p7 = scmp.lt.s32.totalorder %s583_s15, %s583_s15 }
  0x2e   :  { %p590_p8 = por %p589_p7, %p588_p6 }
  0x30   :  { %p591_p9 = pnand %p590_p8, %p584_p5 }
  0x32   :  { %594 = shalt.err (!%p591_p9)
}
  0x33   :  { %54 = dma.hbm_to_vmem [thread:$0]  %s762_s5, 1024, %s49_s18, [#allocation6], %s624_s11, %s624_s11, %s625_s12  }
  0x34   :  { %617 = dma.done.wait [#allocation3], 16  }
  0x35   :  { %618 = vsyncadd [#allocation3], 4294967280 }
  0x36   :  { %619 = dma.done.wait [#allocation6], 1536  }
  0x37   :  { %620 = vsyncadd [#allocation6], 4294965760  ;;  %v628_v0 = vmov 0.0   ;;  %vm629_vm0 = vmmov 0   ;;  %v503_v1 = vld [vmem:[%s758_s1] sm:$0xff]   ;;  %v504_v2 = vld [vmem:[%s758_s1 + $0x8] sm:$0xff]  }
  0x38   :  { %455 = vmatprep.subr.bf16.mxu1 %v628_v0  ;;  %459 = vmatprep.mubr.msk.bf16.mxu1 %vm629_vm0, %v628_v0  ;;  %v67_v3 = vld [vmem:[%s757_s0] sm:$0xff]  ;;  %vm92_vm1 = vcmask 261120   ;;  %v506_v6 = vld [vmem:[#allocation5 + $0x8] sm:$0xff]   ;;  %v507_v7 = vld [vmem:[#allocation5 + $0x10] sm:$0xff]   ;;  %vm199_vm2 = vcmask 523264   ;;  %vm401_vm3 = vcmask 130048  }
  0x39   :  { %475 = vmatprep.subr.bf16.mxu0 %v628_v0  ;;  %491 = vmatprep.mubr.msk.bf16.mxu0 %vm629_vm0, %v628_v0  ;;  %v73_v4 = vpack.c.bf16 %v67_v3, %v67_v3  ;;  %v505_v5 = vld [vmem:[#allocation5] sm:$0xff]   ;;  %v508_v8 = vld [vmem:[#allocation5 + $0x18] sm:$0xff]   ;;  %v510_v40 = vld [vmem:[#allocation7 + $0x8] sm:$0xff]  }
  0x3a   :  { %456 = vmatpush3.bf16.msra.mxu1 %v503_v1  ;;  %v419_v9 = vld [vmem:[#allocation2] ss:$0 sm:$0xff]  ;;  %v509_v39 = vld [vmem:[#allocation7] sm:$0xff]   ;;  %v511_v41 = vld [vmem:[#allocation7 + $0x10] sm:$0xff]  }
  0x3b   :  { %457 = vmatprep.subr.bf16.mxu1 %v628_v0  ;;  %476 = vmatpush3.bf16.msra.mxu0 %v509_v39  ;;  %v512_v42 = vld [vmem:[#allocation7 + $0x18] sm:$0xff]   ;;  %v513_v43 = vld [vmem:[#allocation7 + $0x20] sm:$0xff]   ;;  %v514_v44 = vld [vmem:[#allocation7 + $0x28] sm:$0xff]  }
  0x3c   :  { %477 = vmatprep.subr.bf16.mxu0 %v628_v0  ;;  %v515_v45 = vld [vmem:[#allocation7 + $0x30] sm:$0xff]   ;;  %v516_v46 = vld [vmem:[#allocation7 + $0x38] sm:$0xff]  }
  0x3d   :  { %v423_v47 = vld [vmem:[%s761_s4] ss:$0 sm:$0xff] }
  0x3e   :  { %458 = vmatpush3.bf16.msra.mxu1 %v504_v2 }
  0x3f   :  { %463 = vmatprep.subr.bf16.mxu1 %v628_v0  ;;  %478 = vmatpush3.bf16.msra.mxu0 %v510_v40 }
  0x40   :  { %479 = vmatprep.subr.bf16.mxu0 %v628_v0 }
  0x41   :  { %460 = vmatmul.mubr.msk.bf16.vlgmr.msra.gmra.mrb[0].mxu1 %vm92_vm1, %v73_v4 }
  0x42   :  { %471 = vmatprep.mubr.msk.bf16.mxu1 %vm629_vm0, %v628_v0  ;;  %464 = vmatpush3.bf16.msra.mxu1 %v505_v5 }
  0x43   :  { %465 = vmatprep.subr.bf16.mxu1 %v628_v0  ;;  %480 = vmatpush3.bf16.msra.mxu0 %v511_v41 }
  0x44   :  { %481 = vmatprep.subr.bf16.mxu0 %v628_v0 }
  0x46   :  { %466 = vmatpush3.bf16.msra.mxu1 %v506_v6 }
  0x47   :  { %467 = vmatprep.subr.bf16.mxu1 %v628_v0  ;;  %482 = vmatpush3.bf16.msra.mxu0 %v512_v42 }
  0x48   :  { %483 = vmatprep.subr.bf16.mxu0 %v628_v0 }
  0x4a   :  { %468 = vmatpush3.bf16.msra.mxu1 %v507_v7 }
  0x4b   :  { %469 = vmatprep.subr.bf16.mxu1 %v628_v0  ;;  %484 = vmatpush3.bf16.msra.mxu0 %v513_v43 }
  0x4c   :  { %485 = vmatprep.subr.bf16.mxu0 %v628_v0 }
  0x4e   :  { %470 = vmatpush3.bf16.msra.mxu1 %v508_v8 }
  0x4f   :  { %486 = vmatpush3.bf16.msra.mxu0 %v514_v44 }
  0x50   :  { %487 = vmatprep.subr.bf16.mxu0 %v628_v0 }
  0x53   :  { %488 = vmatpush3.bf16.msra.mxu0 %v515_v45 }
  0x54   :  { %489 = vmatprep.subr.bf16.mxu0 %v628_v0 }
  0x57   :  { %490 = vmatpush3.bf16.msra.mxu0 %v516_v46 }
 0x114   :  { %v130_v10 = vpop.f32.mrb[0].mxu1 }
 0x115   :  { %v131_v11 = vadd.f32 %v419_v9, %v130_v10  ;;  %v461_v12 = vpop.f32.mrb[1].mxu1 }
 0x116   :  { %v133_v13 = vpop.f32.mrb[2].mxu1 }
 0x117   :  { %v136_v14 = vand.u32 2147483647, %v131_v11  ;;  %v462_v15 = vpop.f32.mrb[3].mxu1  ;;  %v429_v13 = vld [vmem:[%s763_s6] ss:$0 sm:$0xff]  ;;  %s630_s6 = smov [#allocation8]  }
 0x118   :  { %s409_s21 = sshll.u32 %s630_s6, 4  ;;  %s410_s21 = int_to_ptr.vmem [resolvable:$true] %s409_s21 }
 0x119   :  { %v137_v16 = vmul.f32 0.70710677, %v136_v14  ;;  %s595_s22 = scalar_lea.vmem %s410_s21, 128  ;;  %p600_p11 = scmp.lt.s32.totalorder %s410_s21, %s410_s21 }
 0x11a   :  { %p596_p10 = scmp.ne.s32.totalorder %s410_s21, %s595_s22  ;;  %p601_p12 = scmp.lt.s32.totalorder %s595_s22, %s595_s22 }
 0x11b   :  { %v138_v17 = vmul.f32 0.3275911, %v137_v16  ;;  %v150_v19 = vsub.f32 0.0, %v137_v16 }
 0x11c   :  { %p602_p13 = por %p601_p12, %p600_p11 }
 0x11d   :  { %v139_v18 = vadd.f32 1.0, %v138_v17  ;;  %v151_v21 = vmul.f32 %v150_v19, %v137_v16 }
 0x11e   :  { %p603_p0 = pnand %p602_p13, %p596_p10 }
 0x11f   :  { %517 = vrcp.f32 %v139_v18  ;;  %v152_v24 = vmul.f32 1.442695, %v151_v21 }
 0x121   :  { %519 = vpow2.f32 %v152_v24 }
 0x129   :  { %v518_v20 = vpop.eup %517 }
 0x12a   :  { %v141_v22 = vmul.f32 1.0614054, %v518_v20 }
 0x12b   :  { %v520_v32 = vpop.eup %519 }
 0x12c   :  { %v142_v23 = vadd.f32 -1.4531521, %v141_v22 }
 0x12e   :  { %v143_v25 = vmul.f32 %v518_v20, %v142_v23 }
 0x130   :  { %v144_v26 = vadd.f32 1.4214138, %v143_v25 }
 0x132   :  { %v145_v27 = vmul.f32 %v518_v20, %v144_v26 }
 0x134   :  { %v146_v28 = vadd.f32 -0.28449672, %v145_v27 }
 0x136   :  { %v147_v29 = vmul.f32 %v518_v20, %v146_v28 }
 0x138   :  { %v148_v30 = vadd.f32 0.2548296, %v147_v29 }
 0x13a   :  { %v149_v31 = vmul.f32 %v518_v20, %v148_v30 }
 0x13c   :  { %v154_v33 = vmul.f32 %v520_v32, %v149_v31 }
 0x13e   :  { %v155_v34 = vsub.f32 1.0, %v154_v33 }
 0x140   :  { %v156_v35 = vmul.f32 %v155_v34, %v136_v14 }
 0x142   :  { %v157_v36 = vadd.f32 %v156_v35, %v131_v11 }
 0x144   :  { %v158_v37 = vmul.f32 0.5, %v157_v36 }
 0x146   :  { %v168_v38 = vpack.c.bf16 %v158_v37, %v158_v37 }
 0x148   :  { %472 = vmatmul.mubr.msk.bf16.vlgmr.msra.gmra.mrb[4].mxu1 %vm199_vm2, %v168_v38 }
 0x21b   :  { %v237_v48 = vpop.f32.mrb[4].mxu1 }
 0x21c   :  { %v238_v49 = vadd.f32 %v423_v47, %v237_v48  ;;  %v473_v50 = vpop.f32.mrb[5].mxu1 }
 0x21d   :  { %v240_v51 = vpop.f32.mrb[6].mxu1 }
 0x21e   :  { %v243_v52 = vand.u32 2147483647, %v238_v49  ;;  %v474_v53 = vpop.f32.mrb[7].mxu1 }
 0x220   :  { %v244_v54 = vmul.f32 0.70710677, %v243_v52 }
 0x222   :  { %v245_v55 = vmul.f32 0.3275911, %v244_v54  ;;  %v257_v57 = vsub.f32 0.0, %v244_v54 }
 0x224   :  { %v246_v56 = vadd.f32 1.0, %v245_v55  ;;  %v258_v59 = vmul.f32 %v257_v57, %v244_v54 }
 0x226   :  { %521 = vrcp.f32 %v246_v56  ;;  %v259_v62 = vmul.f32 1.442695, %v258_v59 }
 0x228   :  { %523 = vpow2.f32 %v259_v62 }
 0x230   :  { %v522_v58 = vpop.eup %521 }
 0x231   :  { %v248_v60 = vmul.f32 1.0614054, %v522_v58 }
 0x232   :  { %v524_v6 = vpop.eup %523 }
 0x233   :  { %v249_v61 = vadd.f32 -1.4531521, %v248_v60 }
 0x235   :  { %v250_v63 = vmul.f32 %v522_v58, %v249_v61 }
 0x237   :  { %v251_v0 = vadd.f32 1.4214138, %v250_v63 }
 0x239   :  { %v252_v1 = vmul.f32 %v522_v58, %v251_v0 }
 0x23b   :  { %v253_v2 = vadd.f32 -0.28449672, %v252_v1 }
 0x23d   :  { %v254_v3 = vmul.f32 %v522_v58, %v253_v2 }
 0x23f   :  { %v255_v4 = vadd.f32 0.2548296, %v254_v3 }
 0x241   :  { %v256_v5 = vmul.f32 %v522_v58, %v255_v4 }
 0x243   :  { %v261_v7 = vmul.f32 %v524_v6, %v256_v5 }
 0x245   :  { %v262_v8 = vsub.f32 1.0, %v261_v7 }
 0x247   :  { %v263_v9 = vmul.f32 %v262_v8, %v243_v52 }
 0x249   :  { %v264_v10 = vadd.f32 %v263_v9, %v238_v49 }
 0x24b   :  { %v265_v11 = vmul.f32 0.5, %v264_v10 }
 0x24d   :  { %v283_v12 = vpack.c.bf16 %v265_v11, %v265_v11 }
 0x24f   :  { %492 = vmatmul.mubr.bf16.vlgmr.msra.gmra.mrb[0].mxu0 %v283_v12 }
 0x322   :  { %v372_v14 = vpop.f32.mrb[0].mxu0 }
 0x323   :  { %v373_v15 = vadd.f32 %v429_v13, %v372_v14  ;;  %v493_v16 = vpop.f32.mrb[1].mxu0 }
 0x324   :  { %v375_v17 = vpop.f32.mrb[2].mxu0 }
 0x325   :  { %v378_v18 = vand.u32 2147483647, %v373_v15  ;;  %v494_v19 = vpop.f32.mrb[3].mxu0 }
 0x327   :  { %v379_v20 = vmul.f32 0.70710677, %v378_v18 }
 0x329   :  { %v380_v21 = vmul.f32 0.3275911, %v379_v20  ;;  %v392_v23 = vsub.f32 0.0, %v379_v20 }
 0x32b   :  { %v381_v22 = vadd.f32 1.0, %v380_v21  ;;  %v393_v25 = vmul.f32 %v392_v23, %v379_v20 }
 0x32d   :  { %525 = vrcp.f32 %v381_v22  ;;  %v394_v28 = vmul.f32 1.442695, %v393_v25 }
 0x32f   :  { %527 = vpow2.f32 %v394_v28 }
 0x337   :  { %v526_v24 = vpop.eup %525 }
 0x338   :  { %v383_v26 = vmul.f32 1.0614054, %v526_v24 }
 0x339   :  { %v528_v36 = vpop.eup %527 }
 0x33a   :  { %v384_v27 = vadd.f32 -1.4531521, %v383_v26 }
 0x33c   :  { %v385_v29 = vmul.f32 %v526_v24, %v384_v27 }
 0x33e   :  { %v386_v30 = vadd.f32 1.4214138, %v385_v29 }
 0x340   :  { %v387_v31 = vmul.f32 %v526_v24, %v386_v30 }
 0x342   :  { %v388_v32 = vadd.f32 -0.28449672, %v387_v31 }
 0x344   :  { %v389_v33 = vmul.f32 %v526_v24, %v388_v32 }
 0x346   :  { %v390_v34 = vadd.f32 0.2548296, %v389_v33 }
 0x348   :  { %v391_v35 = vmul.f32 %v526_v24, %v390_v34 }
 0x34a   :  { %v396_v37 = vmul.f32 %v528_v36, %v391_v35 }
 0x34c   :  { %v397_v38 = vsub.f32 1.0, %v396_v37 }
 0x34e   :  { %v398_v39 = vmul.f32 %v397_v38, %v378_v18 }
 0x350   :  { %v399_v40 = vadd.f32 %v398_v39, %v373_v15 }
 0x352   :  { %v400_v41 = vmul.f32 0.5, %v399_v40 }
 0x354   :  { %402 = vst.msk [vmem:[#allocation8] sm:$0xff] %vm401_vm3, %v400_v41 }
 0x355   :  { %606 = shalt.err (!%p603_p0)
}
 0x356   :  { %s607_s26 = scalar_lea.hbm %s764_s7, 128 }
 0x357   :  { %p608_p1 = scmp.ne.s32.totalorder %s764_s7, %s607_s26  ;;  %p611_p2 = scmp.lt.u32.totalorder %s607_s26, %s764_s7 }
 0x359   :  { %p613_p3 = pnand %p611_p2, %p608_p1 }
 0x35b   :  { %616 = shalt.err (!%p613_p3)
}
 0x35c   :  { %412 = dma.vmem_to_hbm [thread:$0]  %s410_s21, 128, %s764_s7, [#allocation4]  }
 0x35d   :  { %621 = dma.done.wait [#allocation4], 128  }
 0x35e   :  { %622 = vsyncadd [#allocation4], 4294967168 }
 0x35f   :  { %416 = vsyncpa [#allocation3], 1 }
 0x360   :  { %417 = vsyncpa [#allocation6], 1 }
 0x361   :  { %418 = vsyncpa [#allocation4], 1 }

</bundles_post_ra>
